<compile_context>
chip_gen: v7x
topology: tpu7x:2x2x1
jax: 0.10.0
libtpu: 0.0.40
codegen_flags: <defaults>
</compile_context>

<pallas_src>
import jax
import jax.numpy as jnp
from jax.experimental import pallas as pl
from jax.experimental.pallas import tpu as pltpu


def _round_up(x, m):
    return ((x + m - 1) // m) * m


def _cdiv(a, b):
    return -(-a // b)


def _vmem_capacity_bytes():
    """Best-effort physical VMEM query; conservative (v7x per-TC) fallback."""
    try:
        info = pltpu.get_tpu_info()
        for attr in ("vmem_capacity_bytes", "vmem_size_bytes", "vmem_bytes"):
            v = getattr(info, attr, None)
            if v:
                return int(v)
    except Exception:
        pass
    return 64 * 1024 * 1024


def _make_seg_max_kernel(segments):
    """Kernel: one (batch-block, channel-block, lane-tile) block, all segments.

    x_ref : VMEM [Bt, Ct, s, T]
    o_ref : VMEM [n_segs, Bt, Ct, T]
    segments : static tuple of (start, length) ints -> unrolled static slices.
    """

    def kernel(x_ref, o_ref):
        x = x_ref[...]                                   # load block once
        for gi, (start, length) in enumerate(segments):
            seg = x[:, :, start:start + length, :]       # static slice over s
            o_ref[gi] = jnp.max(seg, axis=2).astype(o_ref.dtype)

    return kernel


def pack_sequence_max(seqs, seqL=None, dim=2):
    """PackSequenceWrapper(torch.max).forward(seqs, seqL, options={'dim': 2}).

    seqs: [n, c, s, *spatial]  (float/int dtype; bf16 works as-is)
    seqL: None, or a STATIC tuple of positive segment lengths with sum <= s.
    Returns pooled values: [n, c, *spatial] if seqL is None,
                           [len(seqL)*n, c, *spatial] otherwise.
    """
    if dim != 2:
        raise NotImplementedError("Set pooling is specialized to dim=2 (frame axis).")

    n, c, s = int(seqs.shape[0]), int(seqs.shape[1]), int(seqs.shape[2])
    spatial = tuple(int(d) for d in seqs.shape[3:])
    hw = 1
    for d in spatial:
        hw *= d

    # ---- static segment table -------------------------------------------------
    if seqL is None:
        lens = (s,)
    else:
        lens = tuple(int(v) for v in seqL)
    if any(l <= 0 for l in lens):
        raise ValueError("seqL must contain strictly positive segment lengths.")
    if sum(lens) > s:
        raise ValueError("sum(seqL) exceeds the sequence length of `seqs`.")
    starts, acc = [], 0
    for l in lens:
        starts.append(acc)
        acc += l
    segments = tuple(zip(starts, lens))
    n_segs = len(segments)

    # Free reshape: spatial lands on the lane axis, no transposes anywhere.
    x = seqs.reshape(n, c, s, hw)
    itemsize = jnp.dtype(seqs.dtype).itemsize

    # ---- generation-aware VMEM budget (double-buffered in + out blocks) --------
    phys_vmem = _vmem_capacity_bytes()
    if phys_vmem >= 100 * 1024 * 1024:        # v5e / v6e: 128 MiB physical
        budget = 56 * 1024 * 1024
    else:                                     # v7x: 64 MiB per TensorCore
        budget = 24 * 1024 * 1024

    # ---- lane tiling: balanced, lane-dense, no host-side padding ---------------
    if hw <= 128:
        lane_tile = hw                         # full-dim block (always legal)
    else:
        per_lane = 2 * itemsize * (c * s + n_segs * c)     # 2x: double buffering
        t_cap = max(128, (budget // max(per_lane, 1)) // 128 * 128)
        t_cap = min(t_cap, 32768)
        if t_cap >= hw:
            lane_tile = hw
        else:
            n_tiles = _cdiv(hw, t_cap)
            lane_tile = _round_up(_cdiv(hw, n_tiles), 128)
            if lane_tile >= hw:
                lane_tile = hw
    n_tiles = _cdiv(hw, lane_tile)

    # ---- channel blocking (hardening: only when a 1-batch block overflows) -----
    c_tile = c
    one_batch_bytes = 2 * itemsize * lane_tile * (c * s + n_segs * c)
    if one_batch_bytes > budget and c > 8:
        per_c = 2 * itemsize * lane_tile * (s + n_segs)
        c_tile = max(8, (budget // max(per_c, 1)) // 8 * 8)
        c_tile = min(c_tile, c)
    n_c_blocks = _cdiv(c, c_tile)

    # ---- batch blocking: fill the VMEM budget, keep DMAs large & contiguous ----
    per_b = 2 * itemsize * lane_tile * c_tile * (s + n_segs)
    bt = max(1, budget // max(per_b, 1))
    bt = min(bt, n)
    # Keep >= 2 grid steps when possible so both v7x TensorCores are fed.
    if _cdiv(n, bt) * n_c_blocks * n_tiles < 2 and n >= 2:
        bt = _cdiv(n, 2)
    n_b_blocks = _cdiv(n, bt)

    grid = (n_b_blocks, n_c_blocks, n_tiles)

    in_block_bytes = bt * c_tile * s * lane_tile * itemsize
    out_block_bytes = n_segs * bt * c_tile * lane_tile * itemsize
    needed = 2 * (in_block_bytes + out_block_bytes) + (2 << 20)
    vmem_limit = int(min(max(needed, 32 << 20), int(phys_vmem * 0.9)))

    out = pl.pallas_call(
        _make_seg_max_kernel(segments),
        out_shape=jax.ShapeDtypeStruct((n_segs, n, c, hw), seqs.dtype),
        grid=grid,
        in_specs=[
            pl.BlockSpec(
                (bt, c_tile, s, lane_tile),
                lambda b, cb, t: (b, cb, 0, t),
            ),
        ],
        out_specs=pl.BlockSpec(
            (n_segs, bt, c_tile, lane_tile),
            lambda b, cb, t: (0, b, cb, t),
        ),
        compiler_params=pltpu.CompilerParams(
            dimension_semantics=("parallel", "parallel", "parallel"),
            vmem_limit_bytes=vmem_limit,
        ),
    )(x)

    # torch.cat(rets) order: segment-major, then batch.
    return out.reshape((n_segs * n, c) + spatial)


if __name__ == "__main__":
    # Small shapes consistent with the module: seqs = [n, c, s, h, w]
    n, c, s, h, w = 2, 4, 8, 16, 16

    key = jax.random.PRNGKey(0)
    seqs = jax.random.normal(key, (n, c, s, h, w), dtype=jnp.float32)

    fwd = jax.jit(pack_sequence_max, static_argnames=("seqL", "dim"))

    # --- Path 1: seqL is None  ->  torch.max(seqs, dim=2)[0] -----------------
    y = jax.block_until_ready(fwd(seqs, seqL=None))
    y_ref = jnp.max(seqs, axis=2)
    assert y.shape == (n, c, h, w)
    assert jnp.allclose(y, y_ref)

    # --- Path 2: seqL = (3, 5) -> per-segment max, concat along batch --------
    seqL = (3, 5)
    y2 = jax.block_until_ready(fwd(seqs, seqL=seqL))
    refs = []
    start = 0
    for L in seqL:
        refs.append(jnp.max(seqs[:, :, start:start + L], axis=2))
        start += L
    y2_ref = jnp.concatenate(refs, axis=0)
    assert y2.shape == (len(seqL) * n, c, h, w)
    assert jnp.allclose(y2, y2_ref)

    # --- Path 3: non-128-multiple spatial extent (no host padding needed) ----
    h3, w3 = 7, 9
    seqs3 = jax.random.normal(jax.random.PRNGKey(0), (n, c, s, h3, w3), jnp.float32)
    y3 = jax.block_until_ready(fwd(seqs3, seqL=(2, 6)))
    refs3, start = [], 0
    for L in (2, 6):
        refs3.append(jnp.max(seqs3[:, :, start:start + L], axis=2))
        start += L
    assert y3.shape == (2 * n, c, h3, w3)
    assert jnp.allclose(y3, jnp.concatenate(refs3, axis=0))

    print("KERNEL_OK")
</pallas_src>

<mosaic_0001>
module attributes {stable_mosaic.version = 11 : i64} {
  func.func @kernel(%arg0: i32, %arg1: i32, %arg2: i32, %arg3: memref<1x4x8x256xf32, #tpu.memory_space<vmem>>, %arg4: memref<1x1x4x256xf32, #tpu.memory_space<vmem>>) attributes {dimension_semantics = [#tpu.dimension_semantics<parallel>, #tpu.dimension_semantics<parallel>, #tpu.dimension_semantics<parallel>], iteration_bounds = array<i64: 2, 1, 1>, scalar_prefetch = 0 : i64, scratch_operands = 0 : i64, tpu.core_type = #tpu.core_type<tc>, window_params = [{transform_indices = @transform_0, window_bounds = array<i64: 1, 4, 8, 256>}, {transform_indices = @transform_1, window_bounds = array<i64: 1, 1, 4, 256>}]} {
    %c0 = arith.constant 0 : index
    %c0_0 = arith.constant 0 : index
    %c0_1 = arith.constant 0 : index
    %c0_2 = arith.constant 0 : index
    %0 = vector.load %arg3[%c0, %c0_0, %c0_1, %c0_2] : memref<1x4x8x256xf32, #tpu.memory_space<vmem>>, vector<1x4x8x256xf32>
    %cst = arith.constant dense<0xFF800000> : vector<1x4x256xf32>
    %1 = vector.multi_reduction <maximumf>, %0, %cst [2] : vector<1x4x8x256xf32> to vector<1x4x256xf32>
    %c0_3 = arith.constant 0 : index
    %c0_4 = arith.constant 0 : index
    %c0_5 = arith.constant 0 : index
    %c0_6 = arith.constant 0 : index
    %2 = vector.load %arg4[%c0_3, %c0_4, %c0_5, %c0_6] : memref<1x1x4x256xf32, #tpu.memory_space<vmem>>, vector<1x1x4x256xf32>
    %3 = vector.shape_cast %2 : vector<1x1x4x256xf32> to vector<1x4x256xf32>
    %4 = vector.shape_cast %1 : vector<1x4x256xf32> to vector<1x1x4x256xf32>
    tpu.vector_store %arg4[%c0_3, %c0_4, %c0_5, %c0_6], %4 {strides = array<i32>} : memref<1x1x4x256xf32, #tpu.memory_space<vmem>>, vector<1x1x4x256xf32>,
    return
  }
  func.func @transform_0(%arg0: i32, %arg1: i32, %arg2: i32) -> (i32, i32, i32, i32) {
    %c0_i32 = arith.constant 0 : i32
    %c0_i32_0 = arith.constant 0 : i32
    return %arg0, %arg1, %c0_i32, %arg2 : i32, i32, i32, i32
  }
  func.func @transform_1(%arg0: i32, %arg1: i32, %arg2: i32) -> (i32, i32, i32, i32) {
    %c0_i32 = arith.constant 0 : i32
    %c0_i32_0 = arith.constant 0 : i32
    return %c0_i32, %arg0, %arg1, %arg2 : i32, i32, i32, i32
  }
}

</mosaic_0001>

<bundles_post_ra>
// kernel: pack_sequence_max.1
= control target key start
LH: loop header
LB: loop body
LE: loop exit
PB: predicated region body
PF: predicated region fallthrough
CT: control target
= control target key end

     0   :  { %s460_s6 = smov 0   ;;  %s462_s7 = smov 0   ;;  %s497_s0 = inlined_call_operand.vmem [shape: f32[2,4,8,256], index: 0, kind: input, shape index: {}]   ;;  %s498_s1 = inlined_call_operand.vmem [shape: f32[1,2,4,256], index: 1, kind: output, shape index: {}]  }
   0x1   :  { %s464_s8 = smov 0  }
   0x2 LB: > { %s30_s9 = sadd.s32 1, %s444_s7  ;;  %p393_p0 = scmp.ge.s32.totalorder %s448_s8, 1  ;;  %s448_s8 = sphi %s464_s8, %s11_s8   ;;  %s444_s7 = sphi %s462_s7, %s500_s7   ;;  %s440_s6 = sphi %s460_s6, %s499_s6  }
   0x3   : > { %p32_p1 = scmp.ge.s32.totalorder %s30_s9, 2  ;;  %p125_p2 = scmp.lt.s32.totalorder %s448_s8, 3 }
   0x5   : > { %s502_s9 = smov (%p32_p1, %s30_s9), 0  ;;  %p126_p3 = pnand %p393_p0, %p125_p2 }
   0x6   : > { %p164_p4 = scmp.lt.s32.totalorder (!%p126_p3), %s440_s6, 1  ;;  %vm261_vm0 = vcmask (!%p126_p3), 1041409   ;;  %vm263_vm1 = vcmask (!%p126_p3), 1045509   ;;  %vm266_vm2 = vcmask (!%p126_p3), 1042434   ;;  %vm268_vm3 = vcmask (!%p126_p3), 1046534  }
   0x7   : > { %129 = sbr.rel (%p126_p3) target bundleno = 42 (0x2a), region = 24  ;;  %vm271_vm4 = vcmask (!%p126_p3), 1043459   ;;  %vm273_vm5 = vcmask (!%p126_p3), 1047559  }
   0xe   : > { %s504_s6 = smov (!%p164_p4, %s440_s6), 1 }
   0xf   : > { %s400_s10 = sshll.u32 %s504_s6, 6  ;;  %s401_s14 = sshll.u32 %s504_s6, 3 }
  0x10   : > { %s175_s13 = scalar_lea.vmem %s497_s0, %s400_s10  ;;  %s190_s17 = scalar_lea.vmem %s498_s1, %s401_s14 }
  0x11   : > { %v192_v0 = vld [vmem:[%s175_s13] sm:$0xff]  ;;  %v193_v1 = vld [vmem:[%s175_s13 + $0x8] sm:$0xff]  ;;  %v194_v2 = vld [vmem:[%s175_s13 + $0x10] sm:$0xff] }
  0x12   : > { %v195_v3 = vld [vmem:[%s175_s13 + $0x18] sm:$0xff]  ;;  %v196_v4 = vld [vmem:[%s175_s13 + $0x20] sm:$0xff]  ;;  %v197_v5 = vld [vmem:[%s175_s13 + $0x28] sm:$0xff]  ;;  %v200_v6 = vrot.slane %v192_v0, 4  ;;  %v206_v7 = vrot.slane %v193_v1, 4  ;;  %v212_v8 = vrot.slane %v194_v2, 4 }
  0x13   : > { %v198_v9 = vld [vmem:[%s175_s13 + $0x30] sm:$0xff]  ;;  %v199_v10 = vld [vmem:[%s175_s13 + $0x38] sm:$0xff]  ;;  %v218_v11 = vrot.slane %v195_v3, 4  ;;  %v224_v12 = vrot.slane %v196_v4, 4  ;;  %v230_v13 = vrot.slane %v197_v5, 4 }
  0x14   : > { %v201_v14 = vmax.f32 %v192_v0, %v200_v6  ;;  %v207_v15 = vmax.f32 %v193_v1, %v206_v7  ;;  %v213_v16 = vmax.f32 %v194_v2, %v212_v8  ;;  %v236_v17 = vrot.slane %v198_v9, 4 }
  0x15   : > { %v219_v18 = vmax.f32 %v195_v3, %v218_v11  ;;  %v225_v19 = vmax.f32 %v196_v4, %v224_v12  ;;  %v231_v20 = vmax.f32 %v197_v5, %v230_v13  ;;  %v242_v21 = vrot.slane %v199_v10, 4 }
  0x16   : > { %v202_v22 = vrot.slane %v201_v14, 2  ;;  %v208_v23 = vrot.slane %v207_v15, 2  ;;  %v214_v24 = vrot.slane %v213_v16, 2  ;;  %v237_v25 = vmax.f32 %v198_v9, %v236_v17 }
  0x17   : > { %v220_v26 = vrot.slane %v219_v18, 2  ;;  %v226_v27 = vrot.slane %v225_v19, 2  ;;  %v232_v28 = vrot.slane %v231_v20, 2  ;;  %v243_v29 = vmax.f32 %v199_v10, %v242_v21 }
  0x18   : > { %v203_v30 = vmax.f32 %v201_v14, %v202_v22  ;;  %v209_v31 = vmax.f32 %v207_v15, %v208_v23  ;;  %v215_v32 = vmax.f32 %v213_v16, %v214_v24  ;;  %v238_v33 = vrot.slane %v237_v25, 2 }
  0x19   : > { %v221_v34 = vmax.f32 %v219_v18, %v220_v26  ;;  %v227_v35 = vmax.f32 %v225_v19, %v226_v27  ;;  %v233_v36 = vmax.f32 %v231_v20, %v232_v28  ;;  %v244_v37 = vrot.slane %v243_v29, 2 }
  0x1a   : > { %v204_v38 = vrot.slane %v203_v30, 1  ;;  %v210_v39 = vrot.slane %v209_v31, 1  ;;  %v216_v40 = vrot.slane %v215_v32, 1  ;;  %v239_v41 = vmax.f32 %v237_v25, %v238_v33 }
  0x1b   : > { %v222_v42 = vrot.slane %v221_v34, 1  ;;  %v228_v43 = vrot.slane %v227_v35, 1  ;;  %v234_v44 = vrot.slane %v233_v36, 1  ;;  %v245_v45 = vmax.f32 %v243_v29, %v244_v37 }
  0x1c   : > { %v205_v46 = vmax.f32 %v203_v30, %v204_v38  ;;  %v211_v47 = vmax.f32 %v209_v31, %v210_v39  ;;  %v217_v48 = vmax.f32 %v215_v32, %v216_v40  ;;  %v240_v49 = vrot.slane %v239_v41, 1 }
  0x1d   : > { %v223_v50 = vmax.f32 %v221_v34, %v222_v42  ;;  %v229_v51 = vmax.f32 %v227_v35, %v228_v43  ;;  %v235_v52 = vmax.f32 %v233_v36, %v234_v44  ;;  %v246_v53 = vrot.slane %v245_v45, 1 }
  0x1e   : > { %v241_v54 = vmax.f32 %v239_v41, %v240_v49  ;;  %v256_v56 = vcombine.low %v205_v46, %v211_v47 }
  0x1f   : > { %v247_v55 = vmax.f32 %v245_v45, %v246_v53  ;;  %v257_v57 = vcombine.low %v217_v48, %v223_v50  ;;  %v258_v58 = vcombine.low %v229_v51, %v235_v52 }
  0x21   : > { %v259_v59 = vcombine.low %v241_v54, %v247_v55  ;;  %v260_v60 = vrot.slane %v257_v57, 7  ;;  %v265_v61 = vrot.slane %v258_v58, 6 }
  0x23   : > { %v262_v62 = vsel %vm261_vm0, %v260_v60, %v256_v56  ;;  %v270_v63 = vrot.slane %v259_v59, 5 }
  0x24   : > { %v264_v0 = vsel %vm263_vm1, %v260_v60, %v262_v62 }
  0x25   : > { %v267_v1 = vsel %vm266_vm2, %v265_v61, %v264_v0 }
  0x26   : > { %v269_v2 = vsel %vm268_vm3, %v265_v61, %v267_v1 }
  0x27   : > { %v272_v3 = vsel %vm271_vm4, %v270_v63, %v269_v2 }
  0x28   : > { %v274_v4 = vsel %vm273_vm5, %v270_v63, %v272_v3 }
  0x29   : > { %276 = vst [vmem:[%s190_s17] sm:$0xff] %v274_v4 }
  0x2a PF: > { %s11_s8 = sadd.s32 1, %s448_s8   ;;  %s499_s6 = smov %s444_s7 }
  0x2b   : > { %p8_p5 = scmp.ge.s32.totalorder %s11_s8, 4   ;;  %s500_s7 = smov %s502_s9 }
  0x2d   :  { %10 = sbr.rel (!%p8_p5) target bundleno = 2 (0x2), region = 54 }

</bundles_post_ra>
